<compile_context>
chip_gen: v6e
topology: v6e:2x2x1
jax: 0.10.0
libtpu: 0.0.40
codegen_flags: <defaults>
</compile_context>

<pallas_src>
import jax
import jax.numpy as jnp
from jax.experimental import pallas as pl
from jax.experimental.pallas import tpu as pltpu

# ---------------- model hyper-params (small, consistent with the module) ----
BATCH      = 8
INPUT_DIM  = 16
HIDDEN     = 32          # hidden_size
HIDDEN4    = HIDDEN * 4  # 128
NUM_BLOCKS = 3
DROPOUT_P  = 0.5         # unused at inference
BN_EPS     = 1e-5


# ---------------- Pallas kernel: full forward pass (feature-major) ----------
def model_kernel(x_ref, w1t_ref, wat_ref, wbt_ref, w2c_ref,
                 b1c_ref, bac_ref, bbc_ref, b2_ref, out_ref):
    # x_ref: (TB, IN) f32.  Transpose once per tile (cheap XLU relayout) so the
    # batch tile lies on the lane axis for the rest of the kernel.
    xt = x_ref[...].T.astype(jnp.bfloat16)                        # (IN, TB)

    # fc1: (H, IN) @ (IN, TB) + (H, 1)   -- bf16 MXU, f32 accumulate
    h = jnp.dot(w1t_ref[...], xt,
                preferred_element_type=jnp.float32) + b1c_ref[...]  # (H, TB) f32

    # residual blocks (static unroll — NUM_BLOCKS is a Python constant).
    # BatchNorm is already folded into wat/wbt; Dropout is identity in eval.
    for k in range(NUM_BLOCKS):
        y = jnp.dot(wat_ref[k], h.astype(jnp.bfloat16),
                    preferred_element_type=jnp.float32) + bac_ref[k]
        y = jnp.maximum(y, 0.0)                                   # (4H, TB) f32

        y = jnp.dot(wbt_ref[k], y.astype(jnp.bfloat16),
                    preferred_element_type=jnp.float32) + bbc_ref[k]
        y = jnp.maximum(y, 0.0)                                   # (H, TB) f32

        h = h + y                                                 # residual add

    # fc2 head: per-lane reduction over the 32 feature sublanes, then sigmoid.
    logits = jnp.sum(h * w2c_ref[...], axis=0, keepdims=True) + b2_ref[...]  # (1, TB)
    out_ref[...] = jax.nn.sigmoid(logits)                         # lane-dense store


def _resident(shape):
    """BlockSpec for a weight that stays VMEM-resident across all grid steps."""
    zeros = (0,) * len(shape)
    return pl.BlockSpec(shape, lambda i, _z=zeros: _z)


def model_forward(x, params, batch_tile=1024):
    """Whole ModelWithDropout eval forward in one pallas_call.

    Only x (batch-tiled on sublanes) and the (1, n_tiles*tb) lane-packed output
    row move per grid step; all weights are resident.  With tb=1024 the
    per-tile VMEM footprint is ~1 MiB — far under every generation's limit.
    """
    w1t, wat, wbt, w2c, b1c, bac, bbc, b2 = params
    B, in_dim = x.shape

    if B <= batch_tile:
        tb = B                                  # single full-batch tile
    else:
        tb = max(128, (batch_tile // 128) * 128)  # lane/sublane friendly tile
    n_tiles = pl.cdiv(B, tb)                    # ragged last block handled by Pallas

    out = pl.pallas_call(
        model_kernel,
        out_shape=jax.ShapeDtypeStruct((1, n_tiles * tb), jnp.float32),
        grid_spec=pltpu.PrefetchScalarGridSpec(
            num_scalar_prefetch=0,
            grid=(n_tiles,),
            in_specs=[
                pl.BlockSpec((tb, in_dim), lambda i: (i, 0)),   # x: batch-tiled
                _resident(w1t.shape),                           # (H, IN)    bf16
                _resident(wat.shape),                           # (NB,4H,H)  bf16
                _resident(wbt.shape),                           # (NB,H,4H)  bf16
                _resident(w2c.shape),                           # (H, 1)     f32
                _resident(b1c.shape),                           # (H, 1)     f32
                _resident(bac.shape),                           # (NB,4H,1)  f32
                _resident(bbc.shape),                           # (NB,H,1)   f32
                _resident(b2.shape),                            # (1, 1)     f32
            ],
            out_specs=pl.BlockSpec((1, tb), lambda i: (0, i)),  # lane-packed probs
        ),
        compiler_params=pltpu.CompilerParams(
            dimension_semantics=("parallel",)),                 # 2 TCs on v7x
    )(x, w1t, wat, wbt, w2c, b1c, bac, bbc, b2)

    return out[0, :B][:, None]                                  # (B, 1)


# ---------------- deterministic parameter construction ----------------------
def make_params(key):
    ks = jax.random.split(key, 16)

    def uniform(k, shape, fan_in):
        bound = 1.0 / jnp.sqrt(jnp.float32(fan_in))
        return jax.random.uniform(k, shape, jnp.float32, -bound, bound)

    # fc1 ((in, out) layout)
    w1 = uniform(ks[0], (INPUT_DIM, HIDDEN), INPUT_DIM)
    b1 = uniform(ks[1], (1, HIDDEN), INPUT_DIM)

    # per-block BatchNorm running stats / affine (non-trivial values)
    g1   = 1.0 + 0.1 * jax.random.normal(ks[2], (NUM_BLOCKS, 1, HIDDEN))
    be1  = 0.1 * jax.random.normal(ks[3], (NUM_BLOCKS, 1, HIDDEN))
    mu1  = 0.1 * jax.random.normal(ks[4], (NUM_BLOCKS, 1, HIDDEN))
    var1 = 1.0 + 0.1 * jax.random.uniform(ks[5], (NUM_BLOCKS, 1, HIDDEN))
    g2   = 1.0 + 0.1 * jax.random.normal(ks[6], (NUM_BLOCKS, 1, HIDDEN4))
    be2  = 0.1 * jax.random.normal(ks[7], (NUM_BLOCKS, 1, HIDDEN4))
    mu2  = 0.1 * jax.random.normal(ks[8], (NUM_BLOCKS, 1, HIDDEN4))
    var2 = 1.0 + 0.1 * jax.random.uniform(ks[9], (NUM_BLOCKS, 1, HIDDEN4))

    # BN (eval) as per-feature affine:  y = x*scale + shift
    s1 = g1 / jnp.sqrt(var1 + BN_EPS)
    t1 = be1 - mu1 * s1
    s2 = g2 / jnp.sqrt(var2 + BN_EPS)
    t2 = be2 - mu2 * s2

    # per-block Linear weights (stacked on a leading block axis, (in, out))
    wa = uniform(ks[10], (NUM_BLOCKS, HIDDEN, HIDDEN4), HIDDEN)    # H  -> 4H
    ba = uniform(ks[11], (NUM_BLOCKS, 1, HIDDEN4), HIDDEN)
    wb = uniform(ks[12], (NUM_BLOCKS, HIDDEN4, HIDDEN), HIDDEN4)   # 4H -> H
    bb = uniform(ks[13], (NUM_BLOCKS, 1, HIDDEN), HIDDEN4)

    # fc2
    w2 = uniform(ks[14], (HIDDEN, 1), HIDDEN)
    b2 = uniform(ks[15], (1, 1), HIDDEN)

    # ---- fold BN into the following Linear:  (x*s + t) @ W + b
    #      = x @ (diag(s) @ W) + (t @ W + b)
    wa_f = s1.transpose(0, 2, 1) * wa                              # (NB, H, 4H)
    ba_f = jnp.einsum("koh,khf->kof", t1, wa) + ba                 # (NB, 1, 4H)
    wb_f = s2.transpose(0, 2, 1) * wb                              # (NB, 4H, H)
    bb_f = jnp.einsum("kof,kfh->koh", t2, wb) + bb                 # (NB, 1, H)

    # ---- transposed (feature-major) layout for the kernel
    w1t = w1.T.astype(jnp.bfloat16)                                # (H, IN)
    wat = wa_f.transpose(0, 2, 1).astype(jnp.bfloat16)             # (NB, 4H, H)
    wbt = wb_f.transpose(0, 2, 1).astype(jnp.bfloat16)             # (NB, H, 4H)
    b1c = b1.T                                                     # (H, 1)   f32
    bac = ba_f.transpose(0, 2, 1)                                  # (NB,4H,1) f32
    bbc = bb_f.transpose(0, 2, 1)                                  # (NB,H,1)  f32

    return (w1t, wat, wbt, w2, b1c, bac, bbc, b2)


# ---------------- pure-JAX reference (same eval semantics & dtypes) ---------
def reference_forward(x, params):
    w1t, wat, wbt, w2c, b1c, bac, bbc, b2 = params
    h = jnp.dot(x.astype(jnp.bfloat16), w1t.T,
                preferred_element_type=jnp.float32) + b1c[:, 0]
    for k in range(NUM_BLOCKS):
        y = jnp.maximum(jnp.dot(h.astype(jnp.bfloat16), wat[k].T,
                                preferred_element_type=jnp.float32) + bac[k, :, 0], 0.0)
        y = jnp.maximum(jnp.dot(y.astype(jnp.bfloat16), wbt[k].T,
                                preferred_element_type=jnp.float32) + bbc[k, :, 0], 0.0)
        h = h + y
    logits = jnp.dot(h, w2c) + b2[0, 0]
    return jax.nn.sigmoid(logits)


if __name__ == "__main__":
    key = jax.random.PRNGKey(0)
    kx, kp, kx2 = jax.random.split(key, 3)
    params = make_params(kp)

    # Small demo batch (single full-batch tile, one grid step).
    x = jax.random.normal(kx, (BATCH, INPUT_DIM), jnp.float32)
    out = jax.block_until_ready(model_forward(x, params))
    ref = reference_forward(x, params)
    assert out.shape == (BATCH, 1)
    assert jnp.allclose(out, ref, atol=1e-3, rtol=1e-3)

    # Larger ragged batch: multi-step grid (cdiv, no wrapper pad),
    # lane-packed output, resident weights reused across steps.
    B2 = 2500
    x2 = jax.random.normal(kx2, (B2, INPUT_DIM), jnp.float32)
    out2 = jax.block_until_ready(model_forward(x2, params))
    ref2 = reference_forward(x2, params)
    assert out2.shape == (B2, 1)
    assert jnp.allclose(out2, ref2, atol=1e-3, rtol=1e-3)

    print("KERNEL_OK")
</pallas_src>

<mosaic_0001>
module attributes {stable_mosaic.version = 11 : i64} {
  func.func @model_kernel(%arg0: i32, %arg1: memref<8x16xf32, #tpu.memory_space<vmem>>, %arg2: memref<32x16xbf16, #tpu.memory_space<vmem>>, %arg3: memref<3x128x32xbf16, #tpu.memory_space<vmem>>, %arg4: memref<3x32x128xbf16, #tpu.memory_space<vmem>>, %arg5: memref<32x1xf32, #tpu.memory_space<vmem>>, %arg6: memref<32x1xf32, #tpu.memory_space<vmem>>, %arg7: memref<3x128x1xf32, #tpu.memory_space<vmem>>, %arg8: memref<3x32x1xf32, #tpu.memory_space<vmem>>, %arg9: memref<1x1xf32, #tpu.memory_space<vmem>>, %arg10: memref<1x8xf32, #tpu.memory_space<vmem>>) attributes {dimension_semantics = [#tpu.dimension_semantics<parallel>], iteration_bounds = array<i64: 1>, scalar_prefetch = 0 : i64, scratch_operands = 0 : i64, tpu.core_type = #tpu.core_type<tc>, window_params = [{transform_indices = @transform_0, window_bounds = array<i64: 8, 16>}, {pipeline_mode = #tpu.pipeline_mode<synchronous>, transform_indices = @transform_1, window_bounds = array<i64: 32, 16>}, {pipeline_mode = #tpu.pipeline_mode<synchronous>, transform_indices = @transform_2, window_bounds = array<i64: 3, 128, 32>}, {pipeline_mode = #tpu.pipeline_mode<synchronous>, transform_indices = @transform_3, window_bounds = array<i64: 3, 32, 128>}, {pipeline_mode = #tpu.pipeline_mode<synchronous>, transform_indices = @transform_4, window_bounds = array<i64: 32, 1>}, {pipeline_mode = #tpu.pipeline_mode<synchronous>, transform_indices = @transform_5, window_bounds = array<i64: 32, 1>}, {pipeline_mode = #tpu.pipeline_mode<synchronous>, transform_indices = @transform_6, window_bounds = array<i64: 3, 128, 1>}, {pipeline_mode = #tpu.pipeline_mode<synchronous>, transform_indices = @transform_7, window_bounds = array<i64: 3, 32, 1>}, {pipeline_mode = #tpu.pipeline_mode<synchronous>, transform_indices = @transform_8, window_bounds = array<i64: 1, 1>}, {transform_indices = @transform_9, window_bounds = array<i64: 1, 8>}]} {
    %c0 = arith.constant 0 : index
    %c0_0 = arith.constant 0 : index
    %0 = vector.load %arg1[%c0, %c0_0] : memref<8x16xf32, #tpu.memory_space<vmem>>, vector<8x16xf32>
    %1 = tpu.transpose %0, [1, 0] : vector<8x16xf32> -> vector<16x8xf32>
    %2 = arith.truncf %1 : vector<16x8xf32> to vector<16x8xbf16>
    %c0_1 = arith.constant 0 : index
    %c0_2 = arith.constant 0 : index
    %3 = vector.load %arg2[%c0_1, %c0_2] : memref<32x16xbf16, #tpu.memory_space<vmem>>, vector<32x16xbf16>
    %cst = arith.constant dense<0.000000e+00> : vector<32x8xf32>
    %4 = tpu.matmul %3, %2, %cst {dimension_numbers = #tpu.dot_dimension_numbers<[1], [0], [0], [1], [0, 0, 1, 1], [], []>} : vector<32x16xbf16>, vector<16x8xbf16>, vector<32x8xf32> -> vector<32x8xf32>
    %c0_3 = arith.constant 0 : index
    %c0_4 = arith.constant 0 : index
    %5 = vector.load %arg6[%c0_3, %c0_4] : memref<32x1xf32, #tpu.memory_space<vmem>>, vector<32x1xf32>
    %6 = vector.broadcast %5 : vector<32x1xf32> to vector<32x8xf32>
    %7 = arith.addf %4, %6 : vector<32x8xf32>
    %c0_5 = arith.constant 0 : index
    %c0_6 = arith.constant 0 : index
    %c0_7 = arith.constant 0 : index
    %8 = vector.load %arg3[%c0_5, %c0_6, %c0_7] : memref<3x128x32xbf16, #tpu.memory_space<vmem>>, vector<1x128x32xbf16>
    %9 = vector.shape_cast %8 : vector<1x128x32xbf16> to vector<128x32xbf16>
    %10 = arith.truncf %7 : vector<32x8xf32> to vector<32x8xbf16>
    %cst_8 = arith.constant dense<0.000000e+00> : vector<128x8xf32>
    %11 = tpu.matmul %9, %10, %cst_8 {dimension_numbers = #tpu.dot_dimension_numbers<[1], [0], [0], [1], [0, 0, 1, 1], [], []>} : vector<128x32xbf16>, vector<32x8xbf16>, vector<128x8xf32> -> vector<128x8xf32>
    %c0_9 = arith.constant 0 : index
    %c0_10 = arith.constant 0 : index
    %c0_11 = arith.constant 0 : index
    %12 = vector.load %arg7[%c0_9, %c0_10, %c0_11] : memref<3x128x1xf32, #tpu.memory_space<vmem>>, vector<1x128x1xf32>
    %13 = vector.shape_cast %12 : vector<1x128x1xf32> to vector<128x1xf32>
    %14 = vector.broadcast %13 : vector<128x1xf32> to vector<128x8xf32>
    %15 = arith.addf %11, %14 : vector<128x8xf32>
    %cst_12 = arith.constant 0.000000e+00 : f32
    %16 = vector.broadcast %cst_12 : f32 to vector<128x8xf32>
    %17 = arith.maximumf %15, %16 : vector<128x8xf32>
    %c0_13 = arith.constant 0 : index
    %c0_14 = arith.constant 0 : index
    %c0_15 = arith.constant 0 : index
    %18 = vector.load %arg4[%c0_13, %c0_14, %c0_15] : memref<3x32x128xbf16, #tpu.memory_space<vmem>>, vector<1x32x128xbf16>
    %19 = vector.shape_cast %18 : vector<1x32x128xbf16> to vector<32x128xbf16>
    %20 = arith.truncf %17 : vector<128x8xf32> to vector<128x8xbf16>
    %cst_16 = arith.constant dense<0.000000e+00> : vector<32x8xf32>
    %21 = tpu.matmul %19, %20, %cst_16 {dimension_numbers = #tpu.dot_dimension_numbers<[1], [0], [0], [1], [0, 0, 1, 1], [], []>} : vector<32x128xbf16>, vector<128x8xbf16>, vector<32x8xf32> -> vector<32x8xf32>
    %c0_17 = arith.constant 0 : index
    %c0_18 = arith.constant 0 : index
    %c0_19 = arith.constant 0 : index
    %22 = vector.load %arg8[%c0_17, %c0_18, %c0_19] : memref<3x32x1xf32, #tpu.memory_space<vmem>>, vector<1x32x1xf32>
    %23 = vector.shape_cast %22 : vector<1x32x1xf32> to vector<32x1xf32>
    %24 = vector.broadcast %23 : vector<32x1xf32> to vector<32x8xf32>
    %25 = arith.addf %21, %24 : vector<32x8xf32>
    %cst_20 = arith.constant 0.000000e+00 : f32
    %26 = vector.broadcast %cst_20 : f32 to vector<32x8xf32>
    %27 = arith.maximumf %25, %26 : vector<32x8xf32>
    %28 = arith.addf %7, %27 : vector<32x8xf32>
    %c1 = arith.constant 1 : index
    %c0_21 = arith.constant 0 : index
    %c0_22 = arith.constant 0 : index
    %29 = vector.load %arg3[%c1, %c0_21, %c0_22] : memref<3x128x32xbf16, #tpu.memory_space<vmem>>, vector<1x128x32xbf16>
    %30 = vector.shape_cast %29 : vector<1x128x32xbf16> to vector<128x32xbf16>
    %31 = arith.truncf %28 : vector<32x8xf32> to vector<32x8xbf16>
    %cst_23 = arith.constant dense<0.000000e+00> : vector<128x8xf32>
    %32 = tpu.matmul %30, %31, %cst_23 {dimension_numbers = #tpu.dot_dimension_numbers<[1], [0], [0], [1], [0, 0, 1, 1], [], []>} : vector<128x32xbf16>, vector<32x8xbf16>, vector<128x8xf32> -> vector<128x8xf32>
    %c1_24 = arith.constant 1 : index
    %c0_25 = arith.constant 0 : index
    %c0_26 = arith.constant 0 : index
    %33 = vector.load %arg7[%c1_24, %c0_25, %c0_26] : memref<3x128x1xf32, #tpu.memory_space<vmem>>, vector<1x128x1xf32>
    %34 = vector.shape_cast %33 : vector<1x128x1xf32> to vector<128x1xf32>
    %35 = vector.broadcast %34 : vector<128x1xf32> to vector<128x8xf32>
    %36 = arith.addf %32, %35 : vector<128x8xf32>
    %cst_27 = arith.constant 0.000000e+00 : f32
    %37 = vector.broadcast %cst_27 : f32 to vector<128x8xf32>
    %38 = arith.maximumf %36, %37 : vector<128x8xf32>
    %c1_28 = arith.constant 1 : index
    %c0_29 = arith.constant 0 : index
    %c0_30 = arith.constant 0 : index
    %39 = vector.load %arg4[%c1_28, %c0_29, %c0_30] : memref<3x32x128xbf16, #tpu.memory_space<vmem>>, vector<1x32x128xbf16>
    %40 = vector.shape_cast %39 : vector<1x32x128xbf16> to vector<32x128xbf16>
    %41 = arith.truncf %38 : vector<128x8xf32> to vector<128x8xbf16>
    %cst_31 = arith.constant dense<0.000000e+00> : vector<32x8xf32>
    %42 = tpu.matmul %40, %41, %cst_31 {dimension_numbers = #tpu.dot_dimension_numbers<[1], [0], [0], [1], [0, 0, 1, 1], [], []>} : vector<32x128xbf16>, vector<128x8xbf16>, vector<32x8xf32> -> vector<32x8xf32>
    %c1_32 = arith.constant 1 : index
    %c0_33 = arith.constant 0 : index
    %c0_34 = arith.constant 0 : index
    %43 = vector.load %arg8[%c1_32, %c0_33, %c0_34] : memref<3x32x1xf32, #tpu.memory_space<vmem>>, vector<1x32x1xf32>
    %44 = vector.shape_cast %43 : vector<1x32x1xf32> to vector<32x1xf32>
    %45 = vector.broadcast %44 : vector<32x1xf32> to vector<32x8xf32>
    %46 = arith.addf %42, %45 : vector<32x8xf32>
    %cst_35 = arith.constant 0.000000e+00 : f32
    %47 = vector.broadcast %cst_35 : f32 to vector<32x8xf32>
    %48 = arith.maximumf %46, %47 : vector<32x8xf32>
    %49 = arith.addf %28, %48 : vector<32x8xf32>
    %c2 = arith.constant 2 : index
    %c0_36 = arith.constant 0 : index
    %c0_37 = arith.constant 0 : index
    %50 = vector.load %arg3[%c2, %c0_36, %c0_37] : memref<3x128x32xbf16, #tpu.memory_space<vmem>>, vector<1x128x32xbf16>
    %51 = vector.shape_cast %50 : vector<1x128x32xbf16> to vector<128x32xbf16>
    %52 = arith.truncf %49 : vector<32x8xf32> to vector<32x8xbf16>
    %cst_38 = arith.constant dense<0.000000e+00> : vector<128x8xf32>
    %53 = tpu.matmul %51, %52, %cst_38 {dimension_numbers = #tpu.dot_dimension_numbers<[1], [0], [0], [1], [0, 0, 1, 1], [], []>} : vector<128x32xbf16>, vector<32x8xbf16>, vector<128x8xf32> -> vector<128x8xf32>
    %c2_39 = arith.constant 2 : index
    %c0_40 = arith.constant 0 : index
    %c0_41 = arith.constant 0 : index
    %54 = vector.load %arg7[%c2_39, %c0_40, %c0_41] : memref<3x128x1xf32, #tpu.memory_space<vmem>>, vector<1x128x1xf32>
    %55 = vector.shape_cast %54 : vector<1x128x1xf32> to vector<128x1xf32>
    %56 = vector.broadcast %55 : vector<128x1xf32> to vector<128x8xf32>
    %57 = arith.addf %53, %56 : vector<128x8xf32>
    %cst_42 = arith.constant 0.000000e+00 : f32
    %58 = vector.broadcast %cst_42 : f32 to vector<128x8xf32>
    %59 = arith.maximumf %57, %58 : vector<128x8xf32>
    %c2_43 = arith.constant 2 : index
    %c0_44 = arith.constant 0 : index
    %c0_45 = arith.constant 0 : index
    %60 = vector.load %arg4[%c2_43, %c0_44, %c0_45] : memref<3x32x128xbf16, #tpu.memory_space<vmem>>, vector<1x32x128xbf16>
    %61 = vector.shape_cast %60 : vector<1x32x128xbf16> to vector<32x128xbf16>
    %62 = arith.truncf %59 : vector<128x8xf32> to vector<128x8xbf16>
    %cst_46 = arith.constant dense<0.000000e+00> : vector<32x8xf32>
    %63 = tpu.matmul %61, %62, %cst_46 {dimension_numbers = #tpu.dot_dimension_numbers<[1], [0], [0], [1], [0, 0, 1, 1], [], []>} : vector<32x128xbf16>, vector<128x8xbf16>, vector<32x8xf32> -> vector<32x8xf32>
    %c2_47 = arith.constant 2 : index
    %c0_48 = arith.constant 0 : index
    %c0_49 = arith.constant 0 : index
    %64 = vector.load %arg8[%c2_47, %c0_48, %c0_49] : memref<3x32x1xf32, #tpu.memory_space<vmem>>, vector<1x32x1xf32>
    %65 = vector.shape_cast %64 : vector<1x32x1xf32> to vector<32x1xf32>
    %66 = vector.broadcast %65 : vector<32x1xf32> to vector<32x8xf32>
    %67 = arith.addf %63, %66 : vector<32x8xf32>
    %cst_50 = arith.constant 0.000000e+00 : f32
    %68 = vector.broadcast %cst_50 : f32 to vector<32x8xf32>
    %69 = arith.maximumf %67, %68 : vector<32x8xf32>
    %70 = arith.addf %49, %69 : vector<32x8xf32>
    %c0_51 = arith.constant 0 : index
    %c0_52 = arith.constant 0 : index
    %71 = vector.load %arg5[%c0_51, %c0_52] : memref<32x1xf32, #tpu.memory_space<vmem>>, vector<32x1xf32>
    %72 = vector.broadcast %71 : vector<32x1xf32> to vector<32x8xf32>
    %73 = arith.mulf %70, %72 : vector<32x8xf32>
    %cst_53 = arith.constant dense<0.000000e+00> : vector<8xf32>
    %74 = vector.multi_reduction <add>, %73, %cst_53 [0] : vector<32x8xf32> to vector<8xf32>
    %75 = vector.shape_cast %74 : vector<8xf32> to vector<1x8xf32>
    %c0_54 = arith.constant 0 : index
    %c0_55 = arith.constant 0 : index
    %76 = vector.load %arg9[%c0_54, %c0_55] : memref<1x1xf32, #tpu.memory_space<vmem>>, vector<1x1xf32>
    %77 = vector.broadcast %76 : vector<1x1xf32> to vector<1x8xf32>
    %78 = arith.addf %75, %77 : vector<1x8xf32>
    %79 = arith.negf %78 : vector<1x8xf32>
    %80 = math.exp %79 : vector<1x8xf32>
    %cst_56 = arith.constant 1.000000e+00 : f32
    %81 = vector.broadcast %cst_56 : f32 to vector<1x8xf32>
    %82 = arith.addf %81, %80 : vector<1x8xf32>
    %83 = arith.divf %81, %82 : vector<1x8xf32>
    %c0_57 = arith.constant 0 : index
    %c0_58 = arith.constant 0 : index
    %84 = vector.load %arg10[%c0_57, %c0_58] : memref<1x8xf32, #tpu.memory_space<vmem>>, vector<1x8xf32>
    tpu.vector_store %arg10[%c0_57, %c0_58], %83 {strides = array<i32>} : memref<1x8xf32, #tpu.memory_space<vmem>>, vector<1x8xf32>,
    return
  }
  func.func @transform_0(%arg0: i32) -> (i32, i32) {
    %c0_i32 = arith.constant 0 : i32
    %c0_i32_0 = arith.constant 0 : i32
    return %arg0, %c0_i32 : i32, i32
  }
  func.func @transform_1(%arg0: i32) -> (i32, i32) {
    %c0_i32 = arith.constant 0 : i32
    %c0_i32_0 = arith.constant 0 : i32
    %c0_i32_1 = arith.constant 0 : i32
    return %c0_i32, %c0_i32_0 : i32, i32
  }
  func.func @transform_2(%arg0: i32) -> (i32, i32, i32) {
    %c0_i32 = arith.constant 0 : i32
    %c0_i32_0 = arith.constant 0 : i32
    %c0_i32_1 = arith.constant 0 : i32
    %c0_i32_2 = arith.constant 0 : i32
    return %c0_i32, %c0_i32_0, %c0_i32_1 : i32, i32, i32
  }
  func.func @transform_3(%arg0: i32) -> (i32, i32, i32) {
    %c0_i32 = arith.constant 0 : i32
    %c0_i32_0 = arith.constant 0 : i32
    %c0_i32_1 = arith.constant 0 : i32
    %c0_i32_2 = arith.constant 0 : i32
    return %c0_i32, %c0_i32_0, %c0_i32_1 : i32, i32, i32
  }
  func.func @transform_4(%arg0: i32) -> (i32, i32) {
    %c0_i32 = arith.constant 0 : i32
    %c0_i32_0 = arith.constant 0 : i32
    %c0_i32_1 = arith.constant 0 : i32
    return %c0_i32, %c0_i32_0 : i32, i32
  }
  func.func @transform_5(%arg0: i32) -> (i32, i32) {
    %c0_i32 = arith.constant 0 : i32
    %c0_i32_0 = arith.constant 0 : i32
    %c0_i32_1 = arith.constant 0 : i32
    return %c0_i32, %c0_i32_0 : i32, i32
  }
  func.func @transform_6(%arg0: i32) -> (i32, i32, i32) {
    %c0_i32 = arith.constant 0 : i32
    %c0_i32_0 = arith.constant 0 : i32
    %c0_i32_1 = arith.constant 0 : i32
    %c0_i32_2 = arith.constant 0 : i32
    return %c0_i32, %c0_i32_0, %c0_i32_1 : i32, i32, i32
  }
  func.func @transform_7(%arg0: i32) -> (i32, i32, i32) {
    %c0_i32 = arith.constant 0 : i32
    %c0_i32_0 = arith.constant 0 : i32
    %c0_i32_1 = arith.constant 0 : i32
    %c0_i32_2 = arith.constant 0 : i32
    return %c0_i32, %c0_i32_0, %c0_i32_1 : i32, i32, i32
  }
  func.func @transform_8(%arg0: i32) -> (i32, i32) {
    %c0_i32 = arith.constant 0 : i32
    %c0_i32_0 = arith.constant 0 : i32
    %c0_i32_1 = arith.constant 0 : i32
    return %c0_i32, %c0_i32_0 : i32, i32
  }
  func.func @transform_9(%arg0: i32) -> (i32, i32) {
    %c0_i32 = arith.constant 0 : i32
    %c0_i32_0 = arith.constant 0 : i32
    return %c0_i32, %arg0 : i32, i32
  }
}

</mosaic_0001>

<bundles_post_ra>
// kernel: tpu_custom_call.1
= control target key start
LH: loop header
LB: loop body
LE: loop exit
PB: predicated region body
PF: predicated region fallthrough
CT: control target
= control target key end

     0   :  { %s2289_s0 = inlined_call_operand.vmem [shape: f32[8,16], index: 0, kind: input, shape index: {}]   ;;  %s2290_s1 = inlined_call_operand.vmem [shape: bf16[32,16], index: 1, kind: input, shape index: {}]   ;;  %s2291_s2 = inlined_call_operand.vmem [shape: bf16[3,128,32], index: 2, kind: input, shape index: {}]   ;;  %s2292_s3 = inlined_call_operand.vmem [shape: bf16[3,32,128], index: 3, kind: input, shape index: {}]   ;;  %s2293_s4 = inlined_call_operand.vmem [shape: f32[32,1], index: 4, kind: input, shape index: {}]   ;;  %s2294_s5 = inlined_call_operand.vmem [shape: f32[32,1], index: 5, kind: input, shape index: {}]   ;;  %s2295_s6 = inlined_call_operand.vmem [shape: f32[3,128,1], index: 6, kind: input, shape index: {}]   ;;  %s2296_s7 = inlined_call_operand.vmem [shape: f32[3,32,1], index: 7, kind: input, shape index: {}]   ;;  %s2297_s8 = inlined_call_operand.<no memory space> [shape: f32[1,1], index: 8, kind: input, shape index: {}]   ;;  %s2298_s9 = inlined_call_operand.hbm [shape: f32[1,8], index: 9, kind: output, shape index: {}]  }
   0x1   :  { %v14_v0 = vstv %s2297_s8 }
   0x2   :  { %15 = vst [vmem:[#allocation2] sm:$0x1] %v14_v0 }
   0x3   :  { %v36_v1 = vld [vmem:[%s2289_s0] sm:$0xff]  ;;  %v77_v2 = vld [vmem:[%s2294_s5 + $0x18] sm:$0xff]  ;;  %v1827_v3 = vmov 0   ;;  %v75_v5 = vld [vmem:[%s2294_s5 + $0x8] sm:$0xff]  ;;  %vm108_vm0 = vcmask 130048  }
   0x4   :  { %37 = vxpose.xlu0.b32.start.end [1/1] (short) (narrow) %v36_v1, 16  ;;  %1768 = vset.pattern.permute.xlu1 %v1827_v3  ;;  %v74_v4 = vld [vmem:[%s2294_s5] sm:$0xff]  ;;  %v196_v6 = vld [vmem:[%s2295_s6 + $0x70] sm:$0xff]  ;;  %v197_v8 = vld [vmem:[%s2295_s6 + $0x78] sm:$0xff] }
   0x5   :  { %95 = vperm.xlu1 %1768, %v77_v2   ;;  %v1769_v7 = vld [vmem:[%s2290_s1] sm:$0xff]   ;;  %v195_v10 = vld [vmem:[%s2295_s6 + $0x68] sm:$0xff]  ;;  %v192_v11 = vld [vmem:[%s2295_s6 + $0x50] sm:$0xff] }
   0x6   :  { %1640 = vmatprep.mubr.msk.bf16.mxu0 %vm108_vm0, %v1769_v7  ;;  %v194_v9 = vld [vmem:[%s2295_s6 + $0x60] sm:$0xff]  ;;  %v193_v12 = vld [vmem:[%s2295_s6 + $0x58] sm:$0xff]  ;;  %v191_v14 = vld [vmem:[%s2295_s6 + $0x48] sm:$0xff] }
   0x7   :  { %v190_v13 = vld [vmem:[%s2295_s6 + $0x40] sm:$0xff]  ;;  %v188_v15 = vld [vmem:[%s2295_s6 + $0x30] sm:$0xff] }
   0x8   :  { %v76_v16 = vld [vmem:[%s2294_s5 + $0x10] sm:$0xff] }
   0x9   :  { %80 = vperm.xlu1 %1768, %v74_v4  }
   0xd   :  { %85 = vperm.xlu1 %1768, %v75_v5  }
  0x11   :  { %270 = vperm.xlu1 %1768, %v196_v6  }
  0x15   :  { %275 = vperm.xlu1 %1768, %v197_v8  }
  0x19   :  { %260 = vperm.xlu1 %1768, %v194_v9  }
  0x1d   :  { %265 = vperm.xlu1 %1768, %v195_v10  }
  0x21   :  { %250 = vperm.xlu1 %1768, %v192_v11  }
  0x25   :  { %255 = vperm.xlu1 %1768, %v193_v12  }
  0x29   :  { %240 = vperm.xlu1 %1768, %v190_v13  }
  0x2d   :  { %245 = vperm.xlu1 %1768, %v191_v14   ;;  %1767 = vset.pattern.permute.xlu0 %v1827_v3 }
  0x2e   :  { %16 = vsyncpa [#allocation4], 0  ;;  %v189_v17 = vld [vmem:[%s2295_s6 + $0x38] sm:$0xff]  ;;  %v186_v18 = vld [vmem:[%s2295_s6 + $0x20] sm:$0xff]  ;;  %vm318_vm1 = vcmask 261120   ;;  %vm1389_vm2 = vcmask 64512  }
  0x2f   :  { %v187_v19 = vld [vmem:[%s2295_s6 + $0x28] sm:$0xff]  ;;  %v184_v20 = vld [vmem:[%s2295_s6 + $0x10] sm:$0xff]  ;;  %v185_v21 = vld [vmem:[%s2295_s6 + $0x18] sm:$0xff]  ;;  %vm1420_vm3 = vcmask 57344  }
  0x30   :  { %v182_v22 = vld [vmem:[%s2295_s6] sm:$0xff]  ;;  %v183_v23 = vld [vmem:[%s2295_s6 + $0x8] sm:$0xff]  ;;  %v470_v24 = vld [vmem:[%s2296_s7 + $0x10] sm:$0xff] }
  0x31   :  { %230 = vperm.xlu1 %1768, %v188_v15   ;;  %90 = vperm.xlu0 %1767, %v76_v16   ;;  %v471_v25 = vld [vmem:[%s2296_s7 + $0x18] sm:$0xff]  ;;  %v468_v26 = vld [vmem:[%s2296_s7] sm:$0xff]  ;;  %v469_v27 = vld [vmem:[%s2296_s7 + $0x8] sm:$0xff] }
  0x32   :  { %v1488_v28 = vld [vmem:[%s2295_s6 + $0xf0] sm:$0xff]  ;;  %v1489_v29 = vld [vmem:[%s2295_s6 + $0xf8] sm:$0xff]  ;;  %v1486_v30 = vld [vmem:[%s2295_s6 + $0xe0] sm:$0xff] }
  0x33   :  { %v1487_v31 = vld [vmem:[%s2295_s6 + $0xe8] sm:$0xff]  ;;  %v1484_v32 = vld [vmem:[%s2295_s6 + $0xd0] sm:$0xff]  ;;  %v1485_v33 = vld [vmem:[%s2295_s6 + $0xd8] sm:$0xff] }
  0x34   :  { %v1482_v34 = vld [vmem:[%s2295_s6 + $0xc0] sm:$0xff]  ;;  %v1483_v35 = vld [vmem:[%s2295_s6 + $0xc8] sm:$0xff]  ;;  %v1480_v36 = vld [vmem:[%s2295_s6 + $0xb0] sm:$0xff] }
  0x35   :  { %235 = vperm.xlu1 %1768, %v189_v17   ;;  %220 = vperm.xlu0 %1767, %v186_v18   ;;  %v1481_v37 = vld [vmem:[%s2295_s6 + $0xb8] sm:$0xff]  ;;  %v1478_v38 = vld [vmem:[%s2295_s6 + $0xa0] sm:$0xff]  ;;  %v1479_v39 = vld [vmem:[%s2295_s6 + $0xa8] sm:$0xff] }
  0x36   :  { %v1476_v40 = vld [vmem:[%s2295_s6 + $0x90] sm:$0xff]  ;;  %v1477_v41 = vld [vmem:[%s2295_s6 + $0x98] sm:$0xff]  ;;  %v1474_v42 = vld [vmem:[%s2295_s6 + $0x80] sm:$0xff] }
  0x37   :  { %v1475_v43 = vld [vmem:[%s2295_s6 + $0x88] sm:$0xff]  ;;  %v1512_v44 = vld [vmem:[%s2296_s7 + $0x30] sm:$0xff]  ;;  %v1513_v45 = vld [vmem:[%s2296_s7 + $0x38] sm:$0xff] }
  0x38   :  { %v1510_v46 = vld [vmem:[%s2296_s7 + $0x20] sm:$0xff]  ;;  %v1511_v47 = vld [vmem:[%s2296_s7 + $0x28] sm:$0xff]  ;;  %v1546_v48 = vld [vmem:[%s2295_s6 + $0x170] sm:$0xff] }
  0x39   :  { %225 = vperm.xlu1 %1768, %v187_v19   ;;  %210 = vperm.xlu0 %1767, %v184_v20   ;;  %v1547_v49 = vld [vmem:[%s2295_s6 + $0x178] sm:$0xff]  ;;  %v1544_v50 = vld [vmem:[%s2295_s6 + $0x160] sm:$0xff]  ;;  %v1545_v51 = vld [vmem:[%s2295_s6 + $0x168] sm:$0xff] }
  0x3a   :  { %v1542_v52 = vld [vmem:[%s2295_s6 + $0x150] sm:$0xff]  ;;  %v1543_v53 = vld [vmem:[%s2295_s6 + $0x158] sm:$0xff]  ;;  %v1540_v54 = vld [vmem:[%s2295_s6 + $0x140] sm:$0xff] }
  0x3b   :  { %v1541_v55 = vld [vmem:[%s2295_s6 + $0x148] sm:$0xff]  ;;  %v1538_v56 = vld [vmem:[%s2295_s6 + $0x130] sm:$0xff]  ;;  %v1539_v58 = vld [vmem:[%s2295_s6 + $0x138] sm:$0xff] }
  0x3c   :  { %v1536_v59 = vld [vmem:[%s2295_s6 + $0x120] sm:$0xff]  ;;  %v1537_v62 = vld [vmem:[%s2295_s6 + $0x128] sm:$0xff]  ;;  %v1534_v63 = vld [vmem:[%s2295_s6 + $0x110] sm:$0xff] }
  0x3d   :  { %215 = vperm.xlu1 %1768, %v185_v21   ;;  %200 = vperm.xlu0 %1767, %v182_v22   ;;  %v1770_v0 = vld [vmem:[%s2290_s1 + $0x8] sm:$0xff]   ;;  %v1535_v1 = vld [vmem:[%s2295_s6 + $0x118] sm:$0xff]  ;;  %v1532_v2 = vld [vmem:[%s2295_s6 + $0x100] sm:$0xff] }
  0x3e   :  { %v1533_v3 = vld [vmem:[%s2295_s6 + $0x108] sm:$0xff]  ;;  %v1568_v4 = vld [vmem:[%s2296_s7 + $0x40] sm:$0xff]  ;;  %v1570_v6 = vld [vmem:[%s2296_s7 + $0x50] sm:$0xff] }
  0x3f   :  { %v1569_v5 = vld [vmem:[%s2296_s7 + $0x48] sm:$0xff]  ;;  %v1571_v7 = vld [vmem:[%s2296_s7 + $0x58] sm:$0xff]  ;;  %v1361_v8 = vld [vmem:[%s2293_s4] sm:$0xff] }
  0x40   :  { %v1362_v9 = vld [vmem:[%s2293_s4 + $0x8] sm:$0xff]  ;;  %v1363_v10 = vld [vmem:[%s2293_s4 + $0x10] sm:$0xff]  ;;  %v1364_v11 = vld [vmem:[%s2293_s4 + $0x18] sm:$0xff] }
  0x41   :  { %205 = vperm.xlu1 %1768, %v183_v23   ;;  %484 = vperm.xlu0 %1767, %v470_v24   ;;  %v1403_v12 = vld [vmem:[#allocation2] sm:$0x1] }
  0x42   :  { %v1771_v13 = vld [vmem:[%s2291_s2] sm:$0xff]  }
  0x43   :  { %1648 = vmatprep.mubr.msk.bf16.mxu1 %vm318_vm1, %v1771_v13 }
  0x45   :  { %489 = vperm.xlu1 %1768, %v471_v25   ;;  %474 = vperm.xlu0 %1767, %v468_v26  }
  0x49   :  { %479 = vperm.xlu1 %1768, %v469_v27   ;;  %669 = vperm.xlu0 %1767, %v1488_v28   ;;  %v1772_v28 = vld [vmem:[%s2291_s2 + $0x8] sm:$0xff]  }
  0x4d   :  { %674 = vperm.xlu1 %1768, %v1489_v29   ;;  %659 = vperm.xlu0 %1767, %v1486_v30   ;;  %v1773_v29 = vld [vmem:[%s2291_s2 + $0x10] sm:$0xff]   ;;  %v1774_v30 = vld [vmem:[%s2291_s2 + $0x18] sm:$0xff]  }
  0x51   :  { %664 = vperm.xlu1 %1768, %v1487_v31   ;;  %649 = vperm.xlu0 %1767, %v1484_v32   ;;  %v1775_v31 = vld [vmem:[%s2291_s2 + $0x20] sm:$0xff]   ;;  %v1776_v32 = vld [vmem:[%s2291_s2 + $0x28] sm:$0xff]  }
  0x55   :  { %654 = vperm.xlu1 %1768, %v1485_v33   ;;  %639 = vperm.xlu0 %1767, %v1482_v34   ;;  %v1777_v33 = vld [vmem:[%s2291_s2 + $0x30] sm:$0xff]   ;;  %v1778_v34 = vld [vmem:[%s2291_s2 + $0x38] sm:$0xff]  }
  0x59   :  { %644 = vperm.xlu1 %1768, %v1483_v35   ;;  %629 = vperm.xlu0 %1767, %v1480_v36   ;;  %v1779_v35 = vld [vmem:[%s2292_s3] sm:$0xff]  }
  0x5d   :  { %634 = vperm.xlu1 %1768, %v1481_v37   ;;  %619 = vperm.xlu0 %1767, %v1478_v38  }
  0x61   :  { %624 = vperm.xlu1 %1768, %v1479_v39   ;;  %609 = vperm.xlu0 %1767, %v1476_v40  }
  0x65   :  { %614 = vperm.xlu1 %1768, %v1477_v41   ;;  %599 = vperm.xlu0 %1767, %v1474_v42  }
  0x69   :  { %604 = vperm.xlu1 %1768, %v1475_v43   ;;  %884 = vperm.xlu0 %1767, %v1512_v44  }
  0x6d   :  { %889 = vperm.xlu1 %1768, %v1513_v45   ;;  %874 = vperm.xlu0 %1767, %v1510_v46  }
  0x71   :  { %879 = vperm.xlu1 %1768, %v1511_v47   ;;  %1069 = vperm.xlu0 %1767, %v1546_v48  }
  0x75   :  { %1074 = vperm.xlu1 %1768, %v1547_v49   ;;  %1059 = vperm.xlu0 %1767, %v1544_v50  }
  0x79   :  { %1064 = vperm.xlu1 %1768, %v1545_v51   ;;  %1049 = vperm.xlu0 %1767, %v1542_v52  }
  0x7d   :  { %1054 = vperm.xlu1 %1768, %v1543_v53   ;;  %1039 = vperm.xlu0 %1767, %v1540_v54  }
  0x80   :  { %v53_v57 = vpop.trf.xlu0  ;;  %v96_v14 = vpop.permute.xlu1 %95 }
  0x81   :  { %1044 = vperm.xlu1 %1768, %v1541_v55   ;;  %1029 = vperm.xlu0 %1767, %v1538_v56  }
  0x84   :  { %v54_v60 = vpop.trf.xlu0  ;;  %v81_v15 = vpop.permute.xlu1 %80 }
  0x85   :  { %v69_v61 = vpack.c.bf16 %v54_v60, %v53_v57  ;;  %1034 = vperm.xlu1 %1768, %v1539_v58   ;;  %1019 = vperm.xlu0 %1767, %v1536_v59  }
  0x87   :  { %1638 = vmatprep.subr.bf16.mxu0 %v69_v61 }
  0x88   :  { %1639 = vmatpush3.bf16.msra.mxu0 %v69_v61  ;;  %v86_v22 = vpop.permute.xlu1 %85 }
  0x89   :  { %1024 = vperm.xlu1 %1768, %v1537_v62   ;;  %1009 = vperm.xlu0 %1767, %v1534_v63  }
  0x8b   :  { %1641 = vmatmul.mubr.msk.bf16.vlgmr.msra.gmra.mxu0 %vm108_vm0, %v1770_v0 }
  0x8c   :  { %1680 = vmatprep.mubr.bf16.mxu0 %v1779_v35  ;;  %v271_v36 = vpop.permute.xlu1 %270 }
  0x8d   :  { %1014 = vperm.xlu1 %1768, %v1535_v1   ;;  %999 = vperm.xlu0 %1767, %v1532_v2  }
  0x90   :  { %v276_v37 = vpop.permute.xlu1 %275 }
  0x91   :  { %1004 = vperm.xlu1 %1768, %v1533_v3   ;;  %1274 = vperm.xlu0 %1767, %v1568_v4  }
  0x94   :  { %v261_v38 = vpop.permute.xlu1 %260 }
  0x95   :  { %1279 = vperm.xlu1 %1768, %v1569_v5   ;;  %1284 = vperm.xlu0 %1767, %v1570_v6  }
  0x98   :  { %v266_v39 = vpop.permute.xlu1 %265 }
  0x99   :  { %1289 = vperm.xlu1 %1768, %v1571_v7   ;;  %1367 = vperm.xlu0 %1767, %v1361_v8  }
  0x9c   :  { %v251_v41 = vpop.permute.xlu1 %250 }
  0x9d   :  { %1372 = vperm.xlu1 %1768, %v1362_v9   ;;  %1377 = vperm.xlu0 %1767, %v1363_v10  }
  0xa0   :  { %v256_v45 = vpop.permute.xlu1 %255 }
  0xa1   :  { %1382 = vperm.xlu1 %1768, %v1364_v11   ;;  %1406 = vperm.xlu0 %1767, %v1403_v12  }
  0xa4   :  { %v241_v49 = vpop.permute.xlu1 %240 }
  0xa8   :  { %v246_v53 = vpop.permute.xlu1 %245 }
  0xac   :  { %v91_v18 = vpop.permute.xlu0 %90  ;;  %v231_v57 = vpop.permute.xlu1 %230 }
  0xb0   :  { %v236_v4 = vpop.permute.xlu1 %235 }
 0x14b   :  { %v1642_v16 = vpop.f32.mrf.mxu0 }
 0x14c   :  { %v2101_v20 = vadd.f32 %v1642_v16, %v91_v18  ;;  %v221_v18 = vpop.permute.xlu0 %220 }
 0x14d   :  { %v149_v17 = vpop.f32.mrf.mxu0 }
 0x14e   :  { %v2105_v24 = vadd.f32 %v149_v17, %v81_v15 }
 0x14f   :  { %v1643_v19 = vpop.f32.mrf.mxu0 }
 0x150   :  { %v2103_v21 = vadd.f32 %v1643_v19, %v96_v14  ;;  %v226_v14 = vpop.permute.xlu1 %225 }
 0x151   :  { %v152_v23 = vpop.f32.mrf.mxu0 }
 0x152   :  { %v2107_v25 = vadd.f32 %v152_v23, %v86_v22  ;;  %v181_v26 = vpack.c.bf16 %v2103_v21, %v2101_v20 }
 0x154   :  { %v180_v27 = vpack.c.bf16 %v2107_v25, %v2105_v24  ;;  %1644 = vmatprep.subr.bf16.mxu1 %v181_v26 }
 0x155   :  { %1645 = vmatpush3.bf16.msra.mxu1 %v181_v26 }
 0x156   :  { %1646 = vmatprep.subr.bf16.mxu1 %v180_v27 }
 0x159   :  { %1647 = vmatpush3.bf16.msra.mxu1 %v180_v27 }
 0x15c   :  { %1649 = vmatmul.mubr.msk.bf16.vlgmr.msra.gmra.mxu1 %vm318_vm1, %v1772_v28  ;;  %v216_v28 = vpop.permute.xlu1 %215 }
 0x15d   :  { %1652 = vmatprep.mubr.msk.bf16.mxu1 %vm318_vm1, %v1773_v29 }
 0x164   :  { %1653 = vmatmul.mubr.msk.bf16.gmra.mxu1 %vm318_vm1, %v1774_v30 }
 0x165   :  { %1656 = vmatprep.mubr.msk.bf16.mxu1 %vm318_vm1, %v1775_v31  ;;  %v211_v31 = vpop.permute.xlu0 %210 }
 0x16c   :  { %1657 = vmatmul.mubr.msk.bf16.gmra.mxu1 %vm318_vm1, %v1776_v32 }
 0x16d   :  { %1660 = vmatprep.mubr.msk.bf16.mxu1 %vm318_vm1, %v1777_v33 }
 0x174   :  { %1661 = vmatmul.mubr.msk.bf16.gmra.mxu1 %vm318_vm1, %v1778_v34 }
 0x21c   :  { %v2144_v40 = vpop.f32.mrf.mxu1 }
 0x21d   :  { %v386_v35 = vadd.f32 %v2144_v40, %v211_v31  ;;  %v1780_v40 = vld [vmem:[%s2292_s3 + $0x8] sm:$0xff]  }
 0x21e   :  { %v2146_v42 = vpop.f32.mrf.mxu1 }
 0x220   :  { %v1651_v43 = vpop.f32.mrf.mxu1 }
 0x221   :  { %v389_v32 = vadd.f32 %v1651_v43, %v216_v28 }
 0x222   :  { %v2148_v44 = vpop.f32.mrf.mxu1 }
 0x224   :  { %v1654_v46 = vpop.f32.mrf.mxu1 }
 0x225   :  { %v402_v19 = vadd.f32 %v1654_v46, %v231_v57  ;;  %v442_v46 = vmax.f32 %v386_v35, 0.0 }
 0x226   :  { %v393_v47 = vpop.f32.mrf.mxu1 }
 0x227   :  { %v446_v29 = vmax.f32 %v402_v19, 0.0  ;;  %v394_v30 = vadd.f32 %v393_v47, %v221_v18 }
 0x228   :  { %v1655_v48 = vpop.f32.mrf.mxu1 }
 0x229   :  { %v405_v15 = vadd.f32 %v1655_v48, %v236_v4 }
 0x22a   :  { %v396_v50 = vpop.f32.mrf.mxu1 }
 0x22b   :  { %v447_v23 = vmax.f32 %v405_v15, 0.0  ;;  %v397_v26 = vadd.f32 %v396_v50, %v226_v14 }
 0x22c   :  { %v1658_v51 = vpop.f32.mrf.mxu1 }
 0x22d   :  { %v418_v5 = vadd.f32 %v1658_v51, %v251_v41  ;;  %v463_v33 = vpack.c.bf16 %v447_v23, %v446_v29  ;;  %v445_v34 = vmax.f32 %v397_v26, 0.0 }
 0x22e   :  { %v409_v52 = vpop.f32.mrf.mxu1 }
 0x22f   :  { %v450_v12 = vmax.f32 %v418_v5, 0.0  ;;  %v410_v13 = vadd.f32 %v409_v52, %v241_v49 }
 0x230   :  { %v1659_v54 = vpop.f32.mrf.mxu1 }
 0x231   :  { %v421_v0 = vadd.f32 %v1659_v54, %v256_v45  ;;  %v448_v22 = vmax.f32 %v410_v13, 0.0  ;;  %v201_v45 = vpop.permute.xlu0 %200 }
 0x232   :  { %v412_v55 = vpop.f32.mrf.mxu1  ;;  %v378_v47 = vadd.f32 %v2146_v42, %v201_v45 }
 0x233   :  { %v451_v9 = vmax.f32 %v421_v0, 0.0  ;;  %v413_v10 = vadd.f32 %v412_v55, %v246_v53 }
 0x234   :  { %v1662_v56 = vpop.f32.mrf.mxu1  ;;  %v440_v49 = vmax.f32 %v378_v47, 0.0 }
 0x235   :  { %v434_v59 = vadd.f32 %v1662_v56, %v271_v36  ;;  %v465_v16 = vpack.c.bf16 %v451_v9, %v450_v12  ;;  %v449_v17 = vmax.f32 %v413_v10, 0.0  ;;  %v444_v36 = vmax.f32 %v394_v30, 0.0  ;;  %v485_v42 = vpop.permute.xlu0 %484  ;;  %v1787_v9 = vld [vmem:[%s2291_s2 + $0x70] sm:$0xff]   ;;  %v1788_v10 = vld [vmem:[%s2291_s2 + $0x78] sm:$0xff]  }
 0x236   :  { %v425_v58 = vpop.f32.mrf.mxu1 }
 0x237   :  { %v426_v61 = vadd.f32 %v425_v58, %v261_v38  ;;  %v454_v1 = vmax.f32 %v434_v59, 0.0  ;;  %v464_v27 = vpack.c.bf16 %v449_v17, %v448_v22  ;;  %v443_v38 = vmax.f32 %v389_v32, 0.0 }
 0x238   :  { %v1663_v60 = vpop.f32.mrf.mxu1  ;;  %v462_v41 = vpack.c.bf16 %v445_v34, %v444_v36 }
 0x239   :  { %v437_v62 = vadd.f32 %v1663_v60, %v276_v37  ;;  %v452_v6 = vmax.f32 %v426_v61, 0.0  ;;  %v206_v37 = vpop.permute.xlu1 %205  ;;  %v461_v48 = vpack.c.bf16 %v443_v38, %v442_v46  ;;  %v475_v54 = vpop.permute.xlu0 %474 }
 0x23a   :  { %v428_v63 = vpop.f32.mrf.mxu1 }
 0x23b   :  { %v455_v2 = vmax.f32 %v437_v62, 0.0  ;;  %v429_v3 = vadd.f32 %v428_v63, %v266_v39  ;;  %v381_v39 = vadd.f32 %v2148_v44, %v206_v37  ;;  %v1781_v44 = vld [vmem:[%s2291_s2 + $0x40] sm:$0xff]  }
 0x23c   :  { %1688 = vmatprep.mubr.msk.bf16.mxu1 %vm318_vm1, %v1781_v44 }
 0x23d   :  { %v467_v7 = vpack.c.bf16 %v455_v2, %v454_v1  ;;  %v453_v8 = vmax.f32 %v429_v3, 0.0  ;;  %v441_v43 = vmax.f32 %v381_v39, 0.0  ;;  %v490_v51 = vpop.permute.xlu1 %489  ;;  %v670_v18 = vpop.permute.xlu0 %669 }
 0x23f   :  { %v466_v11 = vpack.c.bf16 %v453_v8, %v452_v6  ;;  %1664 = vmatprep.subr.bf16.mxu0 %v467_v7  ;;  %v460_v50 = vpack.c.bf16 %v441_v43, %v440_v49  ;;  %v1786_v8 = vld [vmem:[%s2291_s2 + $0x68] sm:$0xff]  }
 0x240   :  { %1665 = vmatpush3.bf16.msra.mxu0 %v467_v7 }
 0x241   :  { %1666 = vmatprep.subr.bf16.mxu0 %v466_v11  ;;  %v480_v60 = vpop.permute.xlu1 %479 }
 0x244   :  { %1667 = vmatpush3.bf16.msra.mxu0 %v466_v11  ;;  %v1789_v11 = vld [vmem:[%s2292_s3 + $0x10] sm:$0xff]  }
 0x245   :  { %1668 = vmatprep.subr.bf16.mxu0 %v465_v16 }
 0x248   :  { %1669 = vmatpush3.bf16.msra.mxu0 %v465_v16  ;;  %v675_v16 = vpop.permute.xlu1 %674 }
 0x249   :  { %1670 = vmatprep.subr.bf16.mxu0 %v464_v27 }
 0x24c   :  { %1671 = vmatpush3.bf16.msra.mxu0 %v464_v27  ;;  %v665_v23 = vpop.permute.xlu1 %664  ;;  %v660_v27 = vpop.permute.xlu0 %659 }
 0x24d   :  { %1672 = vmatprep.subr.bf16.mxu0 %v463_v33 }
 0x250   :  { %1673 = vmatpush3.bf16.msra.mxu0 %v463_v33  ;;  %v655_v30 = vpop.permute.xlu1 %654  ;;  %v650_v32 = vpop.permute.xlu0 %649 }
 0x251   :  { %1674 = vmatprep.subr.bf16.mxu0 %v462_v41 }
 0x254   :  { %1675 = vmatpush3.bf16.msra.mxu0 %v462_v41  ;;  %v645_v35 = vpop.permute.xlu1 %644  ;;  %v640_v38 = vpop.permute.xlu0 %639 }
 0x255   :  { %1676 = vmatprep.subr.bf16.mxu0 %v461_v48 }
 0x258   :  { %1677 = vmatpush3.bf16.msra.mxu0 %v461_v48 }
 0x259   :  { %1678 = vmatprep.subr.bf16.mxu0 %v460_v50 }
 0x25c   :  { %1679 = vmatpush3.bf16.msra.mxu0 %v460_v50  ;;  %v635_v50 = vpop.permute.xlu1 %634 }
 0x25f   :  { %1681 = vmatmul.mubr.bf16.vlgmr.msra.gmra.mxu0 %v1780_v40 }
 0x260   :  { %1720 = vmatprep.mubr.bf16.mxu0 %v1789_v11 }
 0x31f   :  { %v1682_v52 = vpop.f32.mrf.mxu0 }
 0x320   :  { %v547_v53 = vadd.f32 %v1682_v52, %v485_v42  ;;  %v630_v52 = vpop.permute.xlu0 %629 }
 0x321   :  { %v538_v55 = vpop.f32.mrf.mxu0 }
 0x322   :  { %v539_v56 = vadd.f32 %v538_v55, %v475_v54  ;;  %v555_v58 = vmax.f32 %v547_v53, 0.0 }
 0x323   :  { %v1683_v57 = vpop.f32.mrf.mxu0 }
 0x324   :  { %v550_v59 = vadd.f32 %v1683_v57, %v490_v51  ;;  %v553_v62 = vmax.f32 %v539_v56, 0.0  ;;  %v2161_v1 = vadd.f32 %v555_v58, %v2101_v20  ;;  %v1782_v20 = vld [vmem:[%s2291_s2 + $0x48] sm:$0xff]   ;;  %v625_v58 = vpop.permute.xlu1 %624 }
 0x325   :  { %v541_v61 = vpop.f32.mrf.mxu0 }
 0x326   :  { %v556_v63 = vmax.f32 %v550_v59, 0.0  ;;  %v542_v0 = vadd.f32 %v541_v61, %v480_v60  ;;  %v2167_v4 = vadd.f32 %v553_v62, %v2105_v24  ;;  %v1784_v24 = vld [vmem:[%s2291_s2 + $0x58] sm:$0xff]   ;;  %v620_v62 = vpop.permute.xlu0 %619 }
 0x328   :  { %v2164_v2 = vadd.f32 %v556_v63, %v2103_v21  ;;  %v554_v3 = vmax.f32 %v542_v0, 0.0  ;;  %v1783_v21 = vld [vmem:[%s2291_s2 + $0x50] sm:$0xff]  }
 0x32a   :  { %v2170_v5 = vadd.f32 %v554_v3, %v2107_v25  ;;  %v579_v6 = vpack.c.bf16 %v2164_v2, %v2161_v1  ;;  %v1785_v25 = vld [vmem:[%s2291_s2 + $0x60] sm:$0xff]  }
 0x32c   :  { %1684 = vmatprep.subr.bf16.mxu1 %v579_v6  ;;  %v578_v7 = vpack.c.bf16 %v2170_v5, %v2167_v4 }
 0x32d   :  { %1685 = vmatpush3.bf16.msra.mxu1 %v579_v6 }
 0x32e   :  { %1686 = vmatprep.subr.bf16.mxu1 %v578_v7 }
 0x331   :  { %1687 = vmatpush3.bf16.msra.mxu1 %v578_v7 }
 0x334   :  { %1689 = vmatmul.mubr.msk.bf16.vlgmr.msra.gmra.mxu1 %vm318_vm1, %v1782_v20  ;;  %v615_v20 = vpop.permute.xlu1 %614 }
 0x335   :  { %1692 = vmatprep.mubr.msk.bf16.mxu1 %vm318_vm1, %v1783_v21 }
 0x33c   :  { %1693 = vmatmul.mubr.msk.bf16.gmra.mxu1 %vm318_vm1, %v1784_v24 }
 0x33d   :  { %1696 = vmatprep.mubr.msk.bf16.mxu1 %vm318_vm1, %v1785_v25  ;;  %v610_v25 = vpop.permute.xlu0 %609 }
 0x344   :  { %1697 = vmatmul.mubr.msk.bf16.gmra.mxu1 %vm318_vm1, %v1786_v8 }
 0x345   :  { %1700 = vmatprep.mubr.msk.bf16.mxu1 %vm318_vm1, %v1787_v9 }
 0x34c   :  { %1701 = vmatmul.mubr.msk.bf16.gmra.mxu1 %vm318_vm1, %v1788_v10 }
 0x3f4   :  { %v2207_v12 = vpop.f32.mrf.mxu1 }
 0x3f5   :  { %v784_v11 = vadd.f32 %v2207_v12, %v610_v25  ;;  %v1790_v12 = vld [vmem:[%s2292_s3 + $0x18] sm:$0xff]  }
 0x3f6   :  { %v2209_v13 = vpop.f32.mrf.mxu1 }
 0x3f8   :  { %v1691_v14 = vpop.f32.mrf.mxu1 }
 0x3f9   :  { %v787_v8 = vadd.f32 %v1691_v14, %v615_v20 }
 0x3fa   :  { %v2211_v15 = vpop.f32.mrf.mxu1 }
 0x3fc   :  { %v1694_v17 = vpop.f32.mrf.mxu1 }
 0x3fd   :  { %v800_v63 = vadd.f32 %v1694_v17, %v630_v52  ;;  %v605_v17 = vpop.permute.xlu1 %604  ;;  %v1796_v52 = vld [vmem:[%s2291_s2 + $0xa8] sm:$0xff]  }
 0x3fe   :  { %v791_v19 = vpop.f32.mrf.mxu1 }
 0x3ff   :  { %v844_v21 = vmax.f32 %v800_v63, 0.0  ;;  %v792_v24 = vadd.f32 %v791_v19, %v620_v62 }
 0x400   :  { %v1695_v22 = vpop.f32.mrf.mxu1 }
 0x401   :  { %v803_v59 = vadd.f32 %v1695_v22, %v635_v50  ;;  %v779_v22 = vadd.f32 %v2211_v15, %v605_v17  ;;  %v1791_v15 = vld [vmem:[%s2291_s2 + $0x80] sm:$0xff]  }
 0x402   :  { %v794_v26 = vpop.f32.mrf.mxu1  ;;  %1728 = vmatprep.mubr.msk.bf16.mxu1 %vm318_vm1, %v1791_v15 }
 0x403   :  { %v845_v3 = vmax.f32 %v803_v59, 0.0  ;;  %v795_v6 = vadd.f32 %v794_v26, %v625_v58  ;;  %v600_v26 = vpop.permute.xlu0 %599  ;;  %v839_v14 = vmax.f32 %v779_v22, 0.0 }
 0x404   :  { %v1698_v28 = vpop.f32.mrf.mxu1  ;;  %v776_v19 = vadd.f32 %v2209_v13, %v600_v26 }
 0x405   :  { %v816_v40 = vadd.f32 %v1698_v28, %v650_v32  ;;  %v862_v9 = vpack.c.bf16 %v845_v3, %v844_v21  ;;  %v843_v10 = vmax.f32 %v795_v6, 0.0 }
 0x406   :  { %v807_v29 = vpop.f32.mrf.mxu1 }
 0x407   :  { %v848_v56 = vmax.f32 %v816_v40, 0.0  ;;  %v808_v57 = vadd.f32 %v807_v29, %v640_v38  ;;  %v838_v29 = vmax.f32 %v776_v19, 0.0  ;;  %v885_v13 = vpop.permute.xlu0 %884 }
 0x408   :  { %v1699_v31 = vpop.f32.mrf.mxu1 }
 0x409   :  { %v819_v47 = vadd.f32 %v1699_v31, %v655_v30  ;;  %v846_v0 = vmax.f32 %v808_v57, 0.0  ;;  %v859_v30 = vpack.c.bf16 %v839_v14, %v838_v29  ;;  %v890_v31 = vpop.permute.xlu1 %889 }
 0x40a   :  { %v810_v33 = vpop.f32.mrf.mxu1 }
 0x40b   :  { %v849_v53 = vmax.f32 %v819_v47, 0.0  ;;  %v811_v54 = vadd.f32 %v810_v33, %v645_v35 }
 0x40c   :  { %v1702_v34 = vpop.f32.mrf.mxu1 }
 0x40d   :  { %v832_v37 = vadd.f32 %v1702_v34, %v670_v18  ;;  %v864_v60 = vpack.c.bf16 %v849_v53, %v848_v56  ;;  %v847_v61 = vmax.f32 %v811_v54, 0.0  ;;  %v841_v18 = vmax.f32 %v787_v8, 0.0  ;;  %v875_v34 = vpop.permute.xlu0 %874  ;;  %v1797_v53 = vld [vmem:[%s2291_s2 + $0xb0] sm:$0xff]   ;;  %v1798_v54 = vld [vmem:[%s2291_s2 + $0xb8] sm:$0xff]  }
 0x40e   :  { %v823_v36 = vpop.f32.mrf.mxu1 }
 0x40f   :  { %v824_v41 = vadd.f32 %v823_v36, %v660_v27  ;;  %v852_v48 = vmax.f32 %v832_v37, 0.0  ;;  %v863_v7 = vpack.c.bf16 %v847_v61, %v846_v0  ;;  %v840_v27 = vmax.f32 %v784_v11, 0.0 }
 0x410   :  { %v1703_v39 = vpop.f32.mrf.mxu1 }
 0x411   :  { %v835_v45 = vadd.f32 %v1703_v39, %v675_v16  ;;  %v850_v44 = vmax.f32 %v824_v41, 0.0  ;;  %v842_v16 = vmax.f32 %v792_v24, 0.0  ;;  %v860_v28 = vpack.c.bf16 %v841_v18, %v840_v27  ;;  %v880_v41 = vpop.permute.xlu1 %879  ;;  %v1070_v62 = vpop.permute.xlu0 %1069 }
 0x412   :  { %v826_v46 = vpop.f32.mrf.mxu1 }
 0x413   :  { %v853_v43 = vmax.f32 %v835_v45, 0.0  ;;  %v827_v49 = vadd.f32 %v826_v46, %v665_v23  ;;  %v861_v23 = vpack.c.bf16 %v843_v10, %v842_v16 }
 0x415   :  { %v866_v42 = vpack.c.bf16 %v853_v43, %v852_v48  ;;  %v851_v51 = vmax.f32 %v827_v49, 0.0 }
 0x417   :  { %v865_v55 = vpack.c.bf16 %v851_v51, %v850_v44  ;;  %1704 = vmatprep.subr.bf16.mxu0 %v866_v42 }
 0x418   :  { %1705 = vmatpush3.bf16.msra.mxu0 %v866_v42 }
 0x419   :  { %1706 = vmatprep.subr.bf16.mxu0 %v865_v55 }
 0x41c   :  { %1707 = vmatpush3.bf16.msra.mxu0 %v865_v55  ;;  %v1799_v55 = vld [vmem:[%s2292_s3 + $0x20] sm:$0xff]  }
 0x41d   :  { %1708 = vmatprep.subr.bf16.mxu0 %v864_v60 }
 0x420   :  { %1709 = vmatpush3.bf16.msra.mxu0 %v864_v60  ;;  %v1075_v60 = vpop.permute.xlu1 %1074 }
 0x421   :  { %1710 = vmatprep.subr.bf16.mxu0 %v863_v7 }
 0x424   :  { %1711 = vmatpush3.bf16.msra.mxu0 %v863_v7  ;;  %v1065_v3 = vpop.permute.xlu1 %1064  ;;  %v1060_v7 = vpop.permute.xlu0 %1059 }
 0x425   :  { %1712 = vmatprep.subr.bf16.mxu0 %v862_v9 }
 0x428   :  { %1713 = vmatpush3.bf16.msra.mxu0 %v862_v9  ;;  %v1055_v24 = vpop.permute.xlu1 %1054  ;;  %v1050_v8 = vpop.permute.xlu0 %1049 }
 0x429   :  { %1714 = vmatprep.subr.bf16.mxu0 %v861_v23 }
 0x42c   :  { %1715 = vmatpush3.bf16.msra.mxu0 %v861_v23  ;;  %v1045_v11 = vpop.permute.xlu1 %1044  ;;  %v1040_v18 = vpop.permute.xlu0 %1039 }
 0x42d   :  { %1716 = vmatprep.subr.bf16.mxu0 %v860_v28 }
 0x430   :  { %1717 = vmatpush3.bf16.msra.mxu0 %v860_v28 }
 0x431   :  { %1718 = vmatprep.subr.bf16.mxu0 %v859_v30 }
 0x434   :  { %1719 = vmatpush3.bf16.msra.mxu0 %v859_v30  ;;  %v1035_v30 = vpop.permute.xlu1 %1034 }
 0x437   :  { %1721 = vmatmul.mubr.bf16.vlgmr.msra.gmra.mxu0 %v1790_v12 }
 0x438   :  { %1760 = vmatprep.mubr.bf16.mxu0 %v1799_v55 }
 0x4f7   :  { %v1722_v32 = vpop.f32.mrf.mxu0 }
 0x4f8   :  { %v947_v33 = vadd.f32 %v1722_v32, %v885_v13  ;;  %v1030_v32 = vpop.permute.xlu0 %1029 }
 0x4f9   :  { %v938_v35 = vpop.f32.mrf.mxu0 }
 0x4fa   :  { %v939_v36 = vadd.f32 %v938_v35, %v875_v34  ;;  %v955_v38 = vmax.f32 %v947_v33, 0.0 }
 0x4fb   :  { %v1723_v37 = vpop.f32.mrf.mxu0 }
 0x4fc   :  { %v950_v39 = vadd.f32 %v1723_v37, %v890_v31  ;;  %v953_v46 = vmax.f32 %v939_v36, 0.0  ;;  %v2224_v43 = vadd.f32 %v955_v38, %v2161_v1  ;;  %v1792_v1 = vld [vmem:[%s2291_s2 + $0x88] sm:$0xff]   ;;  %v1025_v38 = vpop.permute.xlu1 %1024 }
 0x4fd   :  { %v941_v45 = vpop.f32.mrf.mxu0 }
 0x4fe   :  { %v956_v47 = vmax.f32 %v950_v39, 0.0  ;;  %v942_v48 = vadd.f32 %v941_v45, %v880_v41  ;;  %v2230_v40 = vadd.f32 %v953_v46, %v2167_v4  ;;  %v1794_v4 = vld [vmem:[%s2291_s2 + $0x98] sm:$0xff]   ;;  %v1020_v46 = vpop.permute.xlu0 %1019 }
 0x500   :  { %v2227_v49 = vadd.f32 %v956_v47, %v2164_v2  ;;  %v954_v50 = vmax.f32 %v942_v48, 0.0  ;;  %v1793_v2 = vld [vmem:[%s2291_s2 + $0x90] sm:$0xff]  }
 0x502   :  { %v2233_v44 = vadd.f32 %v954_v50, %v2170_v5  ;;  %v979_v42 = vpack.c.bf16 %v2227_v49, %v2224_v43  ;;  %v1795_v5 = vld [vmem:[%s2291_s2 + $0xa0] sm:$0xff]  }
 0x504   :  { %1724 = vmatprep.subr.bf16.mxu1 %v979_v42  ;;  %v978_v51 = vpack.c.bf16 %v2233_v44, %v2230_v40 }
 0x505   :  { %1725 = vmatpush3.bf16.msra.mxu1 %v979_v42 }
 0x506   :  { %1726 = vmatprep.subr.bf16.mxu1 %v978_v51 }
 0x509   :  { %1727 = vmatpush3.bf16.msra.mxu1 %v978_v51 }
 0x50c   :  { %1729 = vmatmul.mubr.msk.bf16.vlgmr.msra.gmra.mxu1 %vm318_vm1, %v1792_v1  ;;  %v1015_v1 = vpop.permute.xlu1 %1014 }
 0x50d   :  { %1732 = vmatprep.mubr.msk.bf16.mxu1 %vm318_vm1, %v1793_v2 }
 0x514   :  { %1733 = vmatmul.mubr.msk.bf16.gmra.mxu1 %vm318_vm1, %v1794_v4 }
 0x515   :  { %1736 = vmatprep.mubr.msk.bf16.mxu1 %vm318_vm1, %v1795_v5  ;;  %v1010_v5 = vpop.permute.xlu0 %1009 }
 0x51c   :  { %1737 = vmatmul.mubr.msk.bf16.gmra.mxu1 %vm318_vm1, %v1796_v52 }
 0x51d   :  { %1740 = vmatprep.mubr.msk.bf16.mxu1 %vm318_vm1, %v1797_v53 }
 0x524   :  { %1741 = vmatmul.mubr.msk.bf16.gmra.mxu1 %vm318_vm1, %v1798_v54 }
 0x5cc   :  { %v2270_v56 = vpop.f32.mrf.mxu1 }
 0x5cd   :  { %v1184_v55 = vadd.f32 %v2270_v56, %v1010_v5  ;;  %v1800_v56 = vld [vmem:[%s2292_s3 + $0x28] sm:$0xff]   ;;  %s1828_s3 = smov [#allocation3]  }
 0x5ce   :  { %v2272_v57 = vpop.f32.mrf.mxu1  ;;  %s1428_s30 = sshll.u32 %s1828_s3, 4  ;;  %s1429_s30 = int_to_ptr.vmem [resolvable:$true] %s1428_s30 }
 0x5cf   :  { %s1805_s10 = scalar_lea.vmem %s1429_s30, 16  ;;  %s1809_s11 = scalar_lea.vmem %s1429_s30, 32 }
 0x5d0   :  { %v1731_v58 = vpop.f32.mrf.mxu1  ;;  %p1806_p0 = scmp.ne.s32.totalorder %s1429_s30, %s1805_s10  ;;  %p1810_p1 = scmp.lt.s32.totalorder %s1429_s30, %s1429_s30 }
 0x5d1   :  { %v1187_v52 = vadd.f32 %v1731_v58, %v1015_v1  ;;  %p1811_p2 = scmp.lt.s32.totalorder %s1809_s11, %s1805_s10 }
 0x5d2   :  { %v2274_v59 = vpop.f32.mrf.mxu1 }
 0x5d3   :  { %p1812_p3 = por %p1811_p2, %p1810_p1 }
 0x5d4   :  { %v1734_v61 = vpop.f32.mrf.mxu1 }
 0x5d5   :  { %v1200_v47 = vadd.f32 %v1734_v61, %v1030_v32  ;;  %v1005_v61 = vpop.permute.xlu1 %1004  ;;  %p1813_p4 = pnand %p1812_p3, %p1806_p0 }
 0x5d6   :  { %v1191_v63 = vpop.f32.mrf.mxu1 }
 0x5d7   :  { %v1244_v2 = vmax.f32 %v1200_v47, 0.0  ;;  %v1192_v4 = vadd.f32 %v1191_v63, %v1020_v46  ;;  %v1409_v46 = vlaneseq }
 0x5d8   :  { %v1735_v0 = vpop.f32.mrf.mxu1 }
 0x5d9   :  { %v1203_v39 = vadd.f32 %v1735_v0, %v1035_v30  ;;  %v1179_v0 = vadd.f32 %v2274_v59, %v1005_v61 }
 0x5da   :  { %v1194_v6 = vpop.f32.mrf.mxu1 }
 0x5db   :  { %v1245_v50 = vmax.f32 %v1203_v39, 0.0  ;;  %v1195_v42 = vadd.f32 %v1194_v6, %v1025_v38  ;;  %v1000_v6 = vpop.permute.xlu0 %999  ;;  %v1239_v58 = vmax.f32 %v1179_v0, 0.0 }
 0x5dc   :  { %v1738_v20 = vpop.f32.mrf.mxu1  ;;  %v1176_v63 = vadd.f32 %v2272_v57, %v1000_v6 }
 0x5dd   :  { %v1216_v12 = vadd.f32 %v1738_v20, %v1050_v8  ;;  %v1262_v53 = vpack.c.bf16 %v1245_v50, %v1244_v2  ;;  %v1243_v54 = vmax.f32 %v1195_v42, 0.0 }
 0x5de   :  { %v1207_v21 = vpop.f32.mrf.mxu1 }
 0x5df   :  { %v1248_v36 = vmax.f32 %v1216_v12, 0.0  ;;  %v1208_v37 = vadd.f32 %v1207_v21, %v1040_v18  ;;  %v1238_v21 = vmax.f32 %v1176_v63, 0.0  ;;  %v1275_v59 = vpop.permute.xlu0 %1274 }
 0x5e0   :  { %v1739_v25 = vpop.f32.mrf.mxu1 }
 0x5e1   :  { %v1219_v19 = vadd.f32 %v1739_v25, %v1055_v24  ;;  %v1246_v48 = vmax.f32 %v1208_v37, 0.0  ;;  %v1259_v24 = vpack.c.bf16 %v1239_v58, %v1238_v21  ;;  %v1280_v25 = vpop.permute.xlu1 %1279 }
 0x5e2   :  { %v1210_v9 = vpop.f32.mrf.mxu1 }
 0x5e3   :  { %v1249_v33 = vmax.f32 %v1219_v19, 0.0  ;;  %v1211_v34 = vadd.f32 %v1210_v9, %v1045_v11  ;;  %v1285_v8 = vpop.permute.xlu0 %1284 }
 0x5e4   :  { %v1742_v10 = vpop.f32.mrf.mxu1 }
 0x5e5   :  { %v1232_v17 = vadd.f32 %v1742_v10, %v1070_v62  ;;  %v1264_v41 = vpack.c.bf16 %v1249_v33, %v1248_v36  ;;  %v1247_v45 = vmax.f32 %v1211_v34, 0.0  ;;  %v1241_v62 = vmax.f32 %v1187_v52, 0.0  ;;  %v1290_v10 = vpop.permute.xlu1 %1289 }
 0x5e6   :  { %v1223_v16 = vpop.f32.mrf.mxu1 }
 0x5e7   :  { %v1224_v23 = vadd.f32 %v1223_v16, %v1060_v7  ;;  %v1252_v28 = vmax.f32 %v1232_v17, 0.0  ;;  %v1263_v51 = vpack.c.bf16 %v1247_v45, %v1246_v48  ;;  %v1240_v7 = vmax.f32 %v1184_v55, 0.0 }
 0x5e8   :  { %v1743_v22 = vpop.f32.mrf.mxu1  ;;  %v1410_v48 = vshrl.u32 %v1409_v46, 7 }
 0x5e9   :  { %v1235_v26 = vadd.f32 %v1743_v22, %v1075_v60  ;;  %v1250_v15 = vmax.f32 %v1224_v23, 0.0  ;;  %v1242_v60 = vmax.f32 %v1192_v4, 0.0  ;;  %v1260_v20 = vpack.c.bf16 %v1241_v62, %v1240_v7 }
 0x5ea   :  { %v1226_v27 = vpop.f32.mrf.mxu1  ;;  %v1411_v42 = vsub.s32 0, %v1410_v48 }
 0x5eb   :  { %v1253_v14 = vmax.f32 %v1235_v26, 0.0  ;;  %v1227_v29 = vadd.f32 %v1226_v27, %v1065_v3  ;;  %v1261_v3 = vpack.c.bf16 %v1243_v54, %v1242_v60  ;;  %v1368_v26 = vpop.permute.xlu0 %1367 }
 0x5ed   :  { %v1266_v13 = vpack.c.bf16 %v1253_v14, %v1252_v28  ;;  %v1251_v31 = vmax.f32 %v1227_v29, 0.0  ;;  %v1373_v29 = vpop.permute.xlu1 %1372 }
 0x5ef   :  { %v1265_v35 = vpack.c.bf16 %v1251_v31, %v1250_v15  ;;  %1744 = vmatprep.subr.bf16.mxu0 %v1266_v13  ;;  %v1378_v32 = vpop.permute.xlu0 %1377 }
 0x5f0   :  { %1745 = vmatpush3.bf16.msra.mxu0 %v1266_v13 }
 0x5f1   :  { %1746 = vmatprep.subr.bf16.mxu0 %v1265_v35 }
 0x5f4   :  { %1747 = vmatpush3.bf16.msra.mxu0 %v1265_v35  ;;  %v1383_v35 = vpop.permute.xlu1 %1382 }
 0x5f5   :  { %1748 = vmatprep.subr.bf16.mxu0 %v1264_v41 }
 0x5f8   :  { %1749 = vmatpush3.bf16.msra.mxu0 %v1264_v41 }
 0x5f9   :  { %1750 = vmatprep.subr.bf16.mxu0 %v1263_v51 }
 0x5fc   :  { %1751 = vmatpush3.bf16.msra.mxu0 %v1263_v51  ;;  %v1407_v51 = vpop.permute.xlu0 %1406 }
 0x5fd   :  { %1752 = vmatprep.subr.bf16.mxu0 %v1262_v53  ;;  %v1412_v2 = vrot.slane %v1407_v51, %v1411_v42 }
 0x600   :  { %1753 = vmatpush3.bf16.msra.mxu0 %v1262_v53 }
 0x601   :  { %1754 = vmatprep.subr.bf16.mxu0 %v1261_v3 }
 0x604   :  { %1755 = vmatpush3.bf16.msra.mxu0 %v1261_v3 }
 0x605   :  { %1756 = vmatprep.subr.bf16.mxu0 %v1260_v20 }
 0x608   :  { %1757 = vmatpush3.bf16.msra.mxu0 %v1260_v20 }
 0x609   :  { %1758 = vmatprep.subr.bf16.mxu0 %v1259_v24 }
 0x60c   :  { %1759 = vmatpush3.bf16.msra.mxu0 %v1259_v24 }
 0x60f   :  { %1761 = vmatmul.mubr.bf16.vlgmr.msra.gmra.mxu0 %v1800_v56 }
 0x6cf   :  { %v1762_v9 = vpop.f32.mrf.mxu0 }
 0x6d0   :  { %v1347_v57 = vadd.f32 %v1762_v9, %v1285_v8 }
 0x6d1   :  { %v1338_v11 = vpop.f32.mrf.mxu0 }
 0x6d2   :  { %v1339_v16 = vadd.f32 %v1338_v11, %v1275_v59  ;;  %v1355_v18 = vmax.f32 %v1347_v57, 0.0 }
 0x6d3   :  { %v1763_v17 = vpop.f32.mrf.mxu0 }
 0x6d4   :  { %v1353_v22 = vmax.f32 %v1339_v16, 0.0  ;;  %v1350_v23 = vadd.f32 %v1763_v17, %v1290_v10  ;;  %v1359_v30 = vadd.f32 %v1355_v18, %v2224_v43 }
 0x6d5   :  { %v1341_v27 = vpop.f32.mrf.mxu0 }
 0x6d6   :  { %v1357_v19 = vadd.f32 %v1353_v22, %v2230_v40  ;;  %v1356_v28 = vmax.f32 %v1350_v23, 0.0  ;;  %v1342_v14 = vadd.f32 %v1341_v27, %v1280_v25  ;;  %v1387_v33 = vmul.f32 %v1378_v32, %v1359_v30 }
 0x6d8   :  { %v1354_v12 = vmax.f32 %v1342_v14, 0.0  ;;  %v1385_v15 = vmul.f32 %v1368_v26, %v1357_v19  ;;  %v1360_v13 = vadd.f32 %v1356_v28, %v2227_v49  ;;  %v1393_v39 = vsel %vm1389_vm2, %v1387_v33, 0.0 }
 0x6da   :  { %v1358_v31 = vadd.f32 %v1354_v12, %v2233_v44  ;;  %v1390_v36 = vsel %vm1389_vm2, %v1385_v15, 0.0  ;;  %v1388_v37 = vmul.f32 %v1383_v35, %v1360_v13 }
 0x6dc   :  { %v1386_v34 = vmul.f32 %v1373_v29, %v1358_v31  ;;  %v1395_v45 = vsel %vm1389_vm2, %v1388_v37, 0.0 }
 0x6de   :  { %v1391_v38 = vsel %vm1389_vm2, %v1386_v34, 0.0 }
 0x6df   :  { %v1392_v40 = vadd.f32 %v1391_v38, %v1390_v36 }
 0x6e1   :  { %v1394_v41 = vadd.f32 %v1393_v39, %v1392_v40 }
 0x6e3   :  { %v1396_v43 = vadd.f32 %v1395_v45, %v1394_v41 }
 0x6e5   :  { %v1397_v47 = vrot.slane %v1396_v43, 4 }
 0x6e7   :  { %v1398_v50 = vadd.f32 %v1397_v47, %v1396_v43 }
 0x6e9   :  { %v1399_v49 = vrot.slane %v1398_v50, 2 }
 0x6eb   :  { %v1400_v44 = vadd.f32 %v1399_v49, %v1398_v50 }
 0x6ed   :  { %v1401_v1 = vrot.slane %v1400_v44, 1 }
 0x6ef   :  { %v1402_v4 = vadd.f32 %v1401_v1, %v1400_v44 }
 0x6f1   :  { %v1413_v5 = vadd.f32 %v1412_v2, %v1402_v4 }
 0x6f3   :  { %v1574_v52 = vmul.f32 -1.442695, %v1413_v5 }
 0x6f5   :  { %1801 = vpow2.f32 %v1574_v52 }
 0x702   :  { %v1802_v53 = vpop.eup %1801 }
 0x703   :  { %v1417_v54 = vadd.f32 1.0, %v1802_v53 }
 0x705   :  { %1803 = vrcp.f32 %v1417_v54 }
 0x712   :  { %v1804_v55 = vpop.eup %1803 }
 0x713   :  { %1421 = vst.msk [vmem:[#allocation3] sm:$0x1] %vm1420_vm3, %v1804_v55 }
 0x714   :  { %1816 = shalt.err (!%p1813_p4)
}
 0x715   :  { %1431 = dma.vmem_to_hbm [thread:$0]  %s1429_s30, 16, %s2298_s9, [#allocation4]  }
 0x716   :  { %1825 = dma.done.wait [#allocation4], 16  }
 0x717   :  { %1826 = vsyncadd [#allocation4], 4294967280 }
 0x718   :  { %1435 = vsyncpa [#allocation4], 1 }

</bundles_post_ra>
